<compile_context>
chip_gen: v5e
topology: v5e:2x2
jax: 0.10.0
libtpu: 0.0.40
codegen_flags: <defaults>
</compile_context>

<pallas_src>
import jax
import jax.numpy as jnp
import numpy as np
from jax.experimental import pallas as pl
from jax.experimental.pallas import tpu as pltpu

# ---- small, module-consistent configuration (scaled-down tdnn layer 0) ----
B = 2            # batch
T = 16           # time steps
C_IN = 32        # in_conv_dim
C_OUT = 32       # out_conv_dim
K = 5            # kernel_size
DIL = 1          # dilation
L = T - DIL * (K - 1)          # output time length after the dilated unfold
C_PAD = 128                    # lane-dense padded output width (multiple of 128)

# Config guards (see correctness review): keep flattening/indexing assumptions explicit.
assert T % 8 == 0, "T must be a multiple of 8 for layout-free (B*T, C) flattening"
assert DIL * (K - 1) < T, "receptive field must fit inside T (L > 0)"
assert L + DIL * (K - 1) == T, "per-batch unfold reads must stay inside the batch"
assert C_PAD % 128 == 0 and C_PAD >= C_OUT


def tdnn_kernel(x_ref, w_ref, b_ref, o_ref):
    """Single invocation (grid=()).

    x_ref: (B*T, C_IN)      f32   VMEM  (time-major, batch-flattened)
    w_ref: (K*C_IN, C_PAD)  bf16  VMEM  (Linear weight^T, lane-padded, prepared once)
    b_ref: (1, C_PAD)       f32   VMEM
    o_ref: (B*T, C_PAD)     f32   VMEM  (full aligned slab; tail rows stripped in wrapper)
    """
    x = x_ref[...].astype(jnp.bfloat16)                       # cast in-kernel (VPU)
    # In-kernel unfold: zero-pad DIL*(K-1) rows, take K row-shifted slices and
    # lane-concatenate -> single fused contraction of depth K*C_IN on the MXU.
    tail = jnp.zeros((DIL * (K - 1), C_IN), jnp.bfloat16)
    xp = jnp.concatenate([x, tail], axis=0)                   # (B*T + DIL*(K-1), C_IN)
    cols = [xp[k * DIL:k * DIL + B * T, :] for k in range(K)]
    x_unf = jnp.concatenate(cols, axis=-1)                    # (B*T, K*C_IN)
    y = jnp.dot(x_unf, w_ref[...], preferred_element_type=jnp.float32)
    # Rows l >= L of each batch slab contain next-batch / zero-pad contributions;
    # they are finite and are stripped in the wrapper.
    o_ref[...] = jnp.maximum(y + b_ref[...], 0.0)


def prepare_params(weight_t, bias):
    """One-time parameter prep (hoisted out of the per-call hot path)."""
    assert weight_t.shape == (K * C_IN, C_OUT) and bias.shape == (C_OUT,)
    w_pad = jnp.pad(weight_t, ((0, 0), (0, C_PAD - C_OUT))).astype(jnp.bfloat16)
    b_pad = jnp.pad(bias, (0, C_PAD - C_OUT)).reshape(1, C_PAD).astype(jnp.float32)
    return w_pad, b_pad


_COST = pl.CostEstimate(
    flops=2 * B * T * (K * C_IN) * C_PAD,
    transcendentals=0,
    bytes_accessed=(B * T * C_IN * 4            # x (f32 in)
                    + K * C_IN * C_PAD * 2      # weight (bf16)
                    + C_PAD * 4                 # bias
                    + B * T * C_PAD * 4),       # out (f32)
)


@jax.jit
def tdnn_layer(x, w_pad, b_pad):
    """x: (B, T, C_IN) f32; (w_pad, b_pad) from prepare_params. Returns (B, L, C_OUT)."""
    x2 = x.reshape(B * T, C_IN)          # metadata-only reshape (T % 8 == 0)
    out_pad = pl.pallas_call(
        tdnn_kernel,
        out_shape=jax.ShapeDtypeStruct((B * T, C_PAD), jnp.float32),
        in_specs=[
            pl.BlockSpec(memory_space=pltpu.MemorySpace.VMEM),
            pl.BlockSpec(memory_space=pltpu.MemorySpace.VMEM),
            pl.BlockSpec(memory_space=pltpu.MemorySpace.VMEM),
        ],
        out_specs=pl.BlockSpec(memory_space=pltpu.MemorySpace.VMEM),
        cost_estimate=_COST,
    )(x2, w_pad, b_pad)
    # Strip the T-L tail rows and the lane padding; keep input dtype (f32).
    return out_pad.reshape(B, T, C_PAD)[:, :L, :C_OUT].astype(x.dtype)


def tdnn_reference(x, weight_t, bias):
    """Pure-JAX reference reproducing the PyTorch forward exactly."""
    cols = [x[:, k * DIL: k * DIL + L, :] for k in range(K)]   # each (B, L, C_IN)
    x_unf = jnp.concatenate(cols, axis=-1)                     # (B, L, K*C_IN)
    y = jnp.einsum("blf,fo->blo", x_unf, weight_t) + bias
    return jnp.maximum(y, 0.0)


if __name__ == "__main__":
    key = jax.random.PRNGKey(0)
    kx, kw, kb = jax.random.split(key, 3)

    # Deterministic parameter init, mimicking nn.Linear(K*C_IN, C_OUT):
    # uniform(-1/sqrt(fan_in), 1/sqrt(fan_in)).
    fan_in = K * C_IN
    bound = 1.0 / np.sqrt(fan_in)
    weight = jax.random.uniform(kw, (C_OUT, fan_in), jnp.float32, -bound, bound)
    bias = jax.random.uniform(kb, (C_OUT,), jnp.float32, -bound, bound)
    weight_t = weight.T  # (K*C_IN, C_OUT)

    x = jax.random.normal(kx, (B, T, C_IN), jnp.float32)

    # Parameter prep done once, outside the per-call path.
    w_pad, b_pad = prepare_params(weight_t, bias)

    out = jax.block_until_ready(tdnn_layer(x, w_pad, b_pad))

    # Reference on bf16-rounded operands: the kernel feeds the MXU bf16 inputs
    # with f32 accumulation (bf16 products are exact in f32), so this isolates
    # accumulation-order differences only.
    x_r = x.astype(jnp.bfloat16).astype(jnp.float32)
    w_r = weight_t.astype(jnp.bfloat16).astype(jnp.float32)
    ref = jax.block_until_ready(tdnn_reference(x_r, w_r, bias))

    np.testing.assert_allclose(np.asarray(out), np.asarray(ref),
                               rtol=1e-3, atol=1e-3)
    assert out.shape == (B, L, C_OUT)

    print("KERNEL_OK")
</pallas_src>

<mosaic_0001>
module attributes {stable_mosaic.version = 11 : i64} {
  func.func @tdnn_kernel(%arg0: memref<32x32xf32, #tpu.memory_space<vmem>>, %arg1: memref<160x128xbf16, #tpu.memory_space<vmem>>, %arg2: memref<1x128xf32, #tpu.memory_space<vmem>>, %arg3: memref<32x128xf32, #tpu.memory_space<vmem>>) attributes {dimension_semantics = [], scalar_prefetch = 0 : i64, scratch_operands = 0 : i64, tpu.core_type = #tpu.core_type<tc>} {
    %c0 = arith.constant 0 : index
    %c0_0 = arith.constant 0 : index
    %0 = vector.load %arg0[%c0, %c0_0] : memref<32x32xf32, #tpu.memory_space<vmem>>, vector<32x32xf32>
    %1 = arith.truncf %0 : vector<32x32xf32> to vector<32x32xbf16>
    %cst = arith.constant 0.000000e+00 : bf16
    %2 = vector.broadcast %cst : bf16 to vector<4x32xbf16>
    %3 = tpu.concatenate %1, %2 in 0 : vector<32x32xbf16>, vector<4x32xbf16> -> vector<36x32xbf16>
    %4 = vector.extract_strided_slice %3 {offsets = [0, 0], sizes = [32, 32], strides = [1, 1]} : vector<36x32xbf16> to vector<32x32xbf16>
    %5 = vector.extract_strided_slice %3 {offsets = [1, 0], sizes = [32, 32], strides = [1, 1]} : vector<36x32xbf16> to vector<32x32xbf16>
    %6 = vector.extract_strided_slice %3 {offsets = [2, 0], sizes = [32, 32], strides = [1, 1]} : vector<36x32xbf16> to vector<32x32xbf16>
    %7 = vector.extract_strided_slice %3 {offsets = [3, 0], sizes = [32, 32], strides = [1, 1]} : vector<36x32xbf16> to vector<32x32xbf16>
    %8 = vector.extract_strided_slice %3 {offsets = [4, 0], sizes = [32, 32], strides = [1, 1]} : vector<36x32xbf16> to vector<32x32xbf16>
    %9 = tpu.concatenate %4, %5, %6, %7, %8 in 1 : vector<32x32xbf16>, vector<32x32xbf16>, vector<32x32xbf16>, vector<32x32xbf16>, vector<32x32xbf16> -> vector<32x160xbf16>
    %c0_1 = arith.constant 0 : index
    %c0_2 = arith.constant 0 : index
    %10 = vector.load %arg1[%c0_1, %c0_2] : memref<160x128xbf16, #tpu.memory_space<vmem>>, vector<160x128xbf16>
    %cst_3 = arith.constant dense<0.000000e+00> : vector<32x128xf32>
    %11 = tpu.matmul %9, %10, %cst_3 {dimension_numbers = #tpu.dot_dimension_numbers<[1], [0], [0], [1], [0, 0, 1, 1], [], []>} : vector<32x160xbf16>, vector<160x128xbf16>, vector<32x128xf32> -> vector<32x128xf32>
    %c0_4 = arith.constant 0 : index
    %c0_5 = arith.constant 0 : index
    %12 = vector.load %arg2[%c0_4, %c0_5] : memref<1x128xf32, #tpu.memory_space<vmem>>, vector<1x128xf32>
    %13 = vector.broadcast %12 : vector<1x128xf32> to vector<32x128xf32>
    %14 = arith.addf %11, %13 : vector<32x128xf32>
    %cst_6 = arith.constant 0.000000e+00 : f32
    %15 = vector.broadcast %cst_6 : f32 to vector<32x128xf32>
    %16 = arith.maximumf %14, %15 : vector<32x128xf32>
    %c0_7 = arith.constant 0 : index
    %c0_8 = arith.constant 0 : index
    %17 = vector.load %arg3[%c0_7, %c0_8] : memref<32x128xf32, #tpu.memory_space<vmem>>, vector<32x128xf32>
    tpu.vector_store %arg3[%c0_7, %c0_8], %16 {strides = array<i32>} : memref<32x128xf32, #tpu.memory_space<vmem>>, vector<32x128xf32>,
    return
  }
}

</mosaic_0001>

<bundles_post_ra>
// kernel: tdnn_layer.1
= control target key start
LH: loop header
LB: loop body
LE: loop exit
PB: predicated region body
PF: predicated region fallthrough
CT: control target
= control target key end

     0   :  { %8 = vsyncpa [#allocation3], 0  ;;  %s490_s0 = inlined_call_operand.hbm [shape: f32[32,32], index: 0, kind: input, shape index: {}]   ;;  %s491_s1 = inlined_call_operand.hbm [shape: bf16[160,128], index: 1, kind: input, shape index: {}]   ;;  %s492_s2 = inlined_call_operand.vmem [shape: f32[1,128], index: 2, kind: input, shape index: {}]   ;;  %s493_s3 = inlined_call_operand.vmem [shape: f32[32,128], index: 3, kind: output, shape index: {}]  }
   0x1   :  { %s14_s14 = sshll.u32 %s490_s0, 4  ;;  %s15_s14 = int_to_ptr.hbm [resolvable:$true] %s14_s14 }
   0x2   :  { %9 = vsyncpa [#allocation5], 0  ;;  %s406_s15 = smov [#allocation2]   ;;  %s27_s19 = sshll.u32 %s491_s1, 4  ;;  %s28_s19 = int_to_ptr.hbm [resolvable:$true] %s27_s19 }
   0x3   :  { %s16_s16 = sshll.u32 %s406_s15, 4  ;;  %s407_s20 = smov 128   ;;  %s17_s16 = int_to_ptr.vmem [resolvable:$true] %s16_s16 }
   0x4   :  { %s408_s21 = smov 8   ;;  %s409_s22 = smov [#allocation4]  }
   0x5   :  { %22 = dma.hbm_to_vmem [thread:$0]  %s15_s14, 512, %s17_s16, [#allocation3], %s407_s20, %s407_s20, %s408_s21  }
   0x6   :  { %s29_s23 = sshll.u32 %s409_s22, 4  ;;  %s410_s24 = smov 64   ;;  %s30_s23 = int_to_ptr.vmem [resolvable:$true] %s29_s23 }
   0x7   :  { %s411_s25 = smov 4  }
   0x8   :  { %35 = dma.hbm_to_vmem [thread:$0]  %s28_s19, 1280, %s30_s23, [#allocation5], %s410_s24, %s410_s24, %s411_s25  }
   0x9   :  { %402 = dma.done.wait [#allocation3], 512  }
   0xa   :  { %403 = vsyncadd [#allocation3], 4294966784 }
   0xb   :  { %404 = dma.done.wait [#allocation5], 1280  }
   0xc   :  { %405 = vsyncadd [#allocation5], 4294966016  ;;  %v49_v0 = vld [vmem:[#allocation2 + $0x10] sm:$0xff]  ;;  %v50_v1 = vld [vmem:[#allocation2 + $0x18] sm:$0xff]  ;;  %v412_v17 = vmov 0   ;;  %vm91_vm1 = vcmask 1046528  }
   0xd   :  { %v47_v2 = vld [vmem:[#allocation2] sm:$0xff]  ;;  %v53_v3 = vpack.c.bf16 %v49_v0, %v49_v0  ;;  %v54_v4 = vpack.c.bf16 %v50_v1, %v50_v1  ;;  %v48_v5 = vld [vmem:[#allocation2 + $0x8] sm:$0xff]  ;;  %v333_v7 = vld [vmem:[#allocation4 + $0x38] sm:$0xff]  ;;  %v84_v18 = vrot.slane %v412_v17, 1  ;;  %vm101_vm0 = vsmask.f32 6400 }
   0xe   :  { %v51_v6 = vpack.c.bf16 %v47_v2, %v47_v2  ;;  %v52_v8 = vpack.c.bf16 %v48_v5, %v48_v5  ;;  %v335_v9 = vld [vmem:[#allocation4 + $0x48] sm:$0xff]  ;;  %336 = vmatpush.bf16.msra.mxu2 %v333_v7  ;;  %232 = vmatpush.bf16.msra.mxu0 %v333_v7  ;;  %v332_v13 = vld [vmem:[#allocation4 + $0x30] sm:$0xff]  ;;  %v334_v15 = vld [vmem:[#allocation4 + $0x40] sm:$0xff]  ;;  %v445_v19 = vrot.slane %v412_v17, 2  ;;  %vm119_vm2 = vcmask 1045504   ;;  %s413_s0 = smov 96  }
   0xf   :  { %v61_v10 = vunpack.c.l.b16 %v53_v3  ;;  %v62_v11 = vunpack.c.l.b16 %v54_v4  ;;  %257 = vmatpush.bf16.msra.mxu1 %v335_v9  ;;  %vm125_vm3 = vcmask 261120   ;;  %v331_v24 = vld [vmem:[#allocation4 + $0x28] sm:$0xff]  ;;  %vm65_vm4 = vsmask.f32 7424  ;;  %v330_v40 = vld [vmem:[#allocation4 + $0x20] sm:$0xff]  ;;  %s414_s1 = smov 32  }
  0x10   :  { %v59_v12 = vunpack.c.l.b16 %v51_v6  ;;  %v60_v14 = vunpack.c.l.b16 %v52_v8  ;;  %v113_v32 = vor.u32 %v445_v19, %v84_v18  ;;  %v329_v46 = vld [vmem:[#allocation4 + $0x18] sm:$0xff]  ;;  %v328_v50 = vld [vmem:[#allocation4 + $0x10] sm:$0xff]  ;;  %v327_v51 = vld [vmem:[#allocation4 + $0x8] sm:$0xff]  ;;  %vm130_vm5 = vcmask 523264  }
  0x11   :  { %v443_v16 = vpack.c.b16 %v62_v11, %v61_v10  ;;  %v326_v52 = vld [vmem:[#allocation4] sm:$0xff]  ;;  %vm135_vm6 = vcmask 785408  }
  0x12   :  { %v447_v20 = vpack.c.b16 %v60_v14, %v59_v12  ;;  %337 = vmatpush.bf16.msra.mxu2 %v332_v13  ;;  %233 = vmatpush.bf16.msra.mxu0 %v332_v13  ;;  %v353_v4 = vld [vmem:[%s492_s2] ss:$0 sm:$0xff] }
  0x13   :  { %v74_v21 = vshll.u32 %v443_v16, 16  ;;  %v78_v22 = vshrl.u32 %v443_v16, 16  ;;  %v93_v23 = vrot.slane %v443_v16, 1  ;;  %v121_v25 = vrot.slane %v443_v16, 2  ;;  %258 = vmatpush.bf16.msra.mxu1 %v334_v15 }
  0x14   :  { %v67_v26 = vshrl.u32 %v447_v20, 16  ;;  %v69_v27 = vshll.u32 %v447_v20, 16  ;;  %v92_v28 = vrot.slane %v447_v20, 1  ;;  %v120_v29 = vrot.slane %v447_v20, 2 }
  0x15   :  { %v105_v30 = vrot.slane %v78_v22, 1  ;;  %v106_v31 = vrot.slane %v74_v21, 2  ;;  %v76_v33 = vrot.slane %v74_v21, 1  ;;  %v96_v48 = vsel %vm91_vm1, %v93_v23, %v84_v18 }
  0x16   :  { %v94_v34 = vsel %vm91_vm1, %v92_v28, %v93_v23  ;;  %v102_v35 = vrot.slane %v67_v26, 1  ;;  %v103_v36 = vrot.slane %v69_v27, 2  ;;  %v71_v39 = vrot.slane %v69_v27, 1  ;;  %338 = vmatpush.bf16.msra.mxu2 %v331_v24  ;;  %234 = vmatpush.bf16.msra.mxu0 %v331_v24 }
  0x17   :  { %v107_v37 = vor.u32 %v106_v31, %v105_v30  ;;  %v80_v38 = vor.u32 %v78_v22, %v76_v33  ;;  %97 = vrot.lane.b32.xlu2 %v94_v34, %s410_s24  ;;  %v122_v41 = vsel %vm119_vm2, %v120_v29, %v121_v25  ;;  %v124_v53 = vsel %vm119_vm2, %v121_v25, %v445_v19 }
  0x18   :  { %v104_v42 = vor.u32 %v103_v36, %v102_v35  ;;  %324 = vmatmul.msk.bf16.vlgmr.msra.gmra.mxu1 %vm125_vm3, %v122_v41  ;;  %v72_v45 = vor.u32 %v71_v39, %v67_v26 }
  0x19   :  { %v114_v43 = vsel %vm101_vm0, %v107_v37, %v113_v32  ;;  %v85_v44 = vsel %vm65_vm4, %v80_v38, %v84_v18 }
  0x1a   :  { %117 = vrot.lane.b32.xlu1 %v114_v43, %s413_s0  ;;  %88 = vrot.lane.b32.xlu0 %v85_v44, %s414_s1  ;;  %v108_v47 = vsel %vm101_vm0, %v104_v42, %v107_v37  ;;  %v77_v49 = vsel %vm65_vm4, %v72_v45, %v76_v33 }
  0x1b   :  { %339 = vmatpush.bf16.msra.mxu2 %v330_v40  ;;  %235 = vmatpush.bf16.msra.mxu0 %v330_v40 }
  0x1f   :  { %115 = vrot.lane.b32.xlu2 %v108_v47, %s413_s0  ;;  %340 = vmatpush.bf16.msra.mxu2 %v329_v46 }
  0x20   :  { %236 = vmatpush.bf16.msra.mxu0 %v329_v46 }
  0x22   :  { %99 = vrot.lane.b32.xlu0 %v96_v48, %s410_s24  ;;  %86 = vrot.lane.b32.xlu1 %v77_v49, %s414_s1 }
  0x23   :  { %341 = vmatpush.bf16.msra.mxu2 %v328_v50 }
  0x24   :  { %237 = vmatpush.bf16.msra.mxu0 %v328_v50 }
  0x27   :  { %342 = vmatpush.bf16.msra.mxu2 %v327_v51 }
  0x28   :  { %238 = vmatpush.bf16.msra.mxu0 %v327_v51  ;;  %325 = vmatmul.msk.bf16.gmra.mxu1 %vm125_vm3, %v124_v53 }
  0x2b   :  { %343 = vmatpush.bf16.msra.mxu2 %v326_v52 }
  0x2c   :  { %239 = vmatpush.bf16.msra.mxu0 %v326_v52 }
  0x71   :  { %v98_v54 = vpop.permute.xlu2 %97 }
  0x79   :  { %v116_v57 = vpop.permute.xlu2 %115 }
  0x8c   :  { %v118_v55 = vpop.permute.xlu1 %117  ;;  %v89_v56 = vpop.permute.xlu0 %88 }
  0x8d   :  { %v129_v58 = vsel %vm125_vm3, %v443_v16, %v89_v56 }
  0x94   :  { %v100_v59 = vpop.permute.xlu0 %99  ;;  %v87_v60 = vpop.permute.xlu1 %86 }
  0x95   :  { %v134_v61 = vsel %vm130_vm5, %v129_v58, %v100_v59  ;;  %v127_v62 = vsel %vm125_vm3, %v447_v20, %v87_v60  ;;  %v260_v2 = vpop.f32.mrf.mxu1 }
  0x96   :  { %v140_v63 = vsel %vm135_vm6, %v134_v61, %v118_v55  ;;  %v132_v0 = vsel %vm130_vm5, %v127_v62, %v98_v54 }
  0x97   :  { %245 = vmatmul.bf16.vlgmr.msra.gmra.mxu2 %v140_v63  ;;  %v137_v1 = vsel %vm135_vm6, %v132_v0, %v116_v57 }
  0x98   :  { %240 = vmatmul.bf16.vlgmr.msra.gmra.mxu0 %v137_v1 }
  0x9d   :  { %v262_v3 = vpop.f32.mrf.mxu1 }
  0xa5   :  { %v265_v8 = vpop.f32.mrf.mxu1 }
  0xad   :  { %v267_v20 = vpop.f32.mrf.mxu1 }
 0x115   :  { %v241_v5 = vpop.f32.mrf.mxu0 }
 0x116   :  { %v242_v6 = vadd.f32 %v353_v4, %v241_v5 }
 0x118   :  { %v261_v7 = vadd.f32 %v260_v2, %v242_v6 }
 0x11a   :  { %v270_v9 = vmax.f32 %v261_v7, 0.0  ;;  %v246_v10 = vpop.f32.mrf.mxu2 }
 0x11b   :  { %v247_v11 = vadd.f32 %v353_v4, %v246_v10 }
 0x11c   :  { %274 = vst [vmem:[%s493_s3] sm:$0xff] %v270_v9 }
 0x11d   :  { %v266_v12 = vadd.f32 %v265_v8, %v247_v11  ;;  %v243_v13 = vpop.f32.mrf.mxu0 }
 0x11e   :  { %v244_v14 = vadd.f32 %v353_v4, %v243_v13 }
 0x11f   :  { %v272_v15 = vmax.f32 %v266_v12, 0.0 }
 0x120   :  { %v263_v16 = vadd.f32 %v262_v3, %v244_v14 }
 0x121   :  { %276 = vst [vmem:[%s493_s3 + $0x10] sm:$0xff] %v272_v15 }
 0x122   :  { %v271_v17 = vmax.f32 %v263_v16, 0.0  ;;  %v248_v18 = vpop.f32.mrf.mxu2 }
 0x123   :  { %v249_v19 = vadd.f32 %v353_v4, %v248_v18 }
 0x124   :  { %275 = vst [vmem:[%s493_s3 + $0x8] sm:$0xff] %v271_v17 }
 0x125   :  { %v268_v21 = vadd.f32 %v267_v20, %v249_v19 }
 0x127   :  { %v273_v22 = vmax.f32 %v268_v21, 0.0 }
 0x129   :  { %277 = vst [vmem:[%s493_s3 + $0x18] sm:$0xff] %v273_v22 }
 0x12a   :  { %282 = vsyncpa [#allocation3], 1 }
 0x12b   :  { %283 = vsyncpa [#allocation5], 1 }

</bundles_post_ra>
